<compile_context>
chip_gen: v5e
topology: v5e:2x2
jax: 0.10.0
libtpu: 0.0.40
codegen_flags: <defaults>
</compile_context>

<pallas_src>
import jax
import jax.numpy as jnp
from jax.experimental import pallas as pl
from jax.experimental.pallas import tpu as pltpu


def _round_up(x, m):
    return (x + m - 1) // m * m


# -----------------------------------------------------------------------------
# Kernels
# -----------------------------------------------------------------------------
def _ffn_kernel_f32out(x_ref, w1_ref, b1_ref, w2_ref, b2_ref, o_ref):
    """fc1 -> relu -> fc2; f32 output tile doubles as the k-axis accumulator."""
    k = pl.program_id(1)

    h = jnp.dot(x_ref[...], w1_ref[...], preferred_element_type=jnp.float32)
    h = jnp.maximum(h + b1_ref[...], 0.0)
    # dropout == identity (inference mode).
    part = jnp.dot(h.astype(w2_ref.dtype), w2_ref[...],
                   preferred_element_type=jnp.float32)

    @pl.when(k == 0)
    def _():
        o_ref[...] = part

    @pl.when(k > 0)
    def _():
        o_ref[...] += part

    @pl.when(k == pl.num_programs(1) - 1)
    def _():
        o_ref[...] = o_ref[...] + b2_ref[...]


def _ffn_kernel_scratch(x_ref, w1_ref, b1_ref, w2_ref, b2_ref, o_ref, acc_ref):
    """Same, but with a separate f32 accumulator for non-f32 output dtypes."""
    k = pl.program_id(1)

    h = jnp.dot(x_ref[...], w1_ref[...], preferred_element_type=jnp.float32)
    h = jnp.maximum(h + b1_ref[...], 0.0)
    part = jnp.dot(h.astype(w2_ref.dtype), w2_ref[...],
                   preferred_element_type=jnp.float32)

    @pl.when(k == 0)
    def _():
        acc_ref[...] = part

    @pl.when(k > 0)
    def _():
        acc_ref[...] += part

    @pl.when(k == pl.num_programs(1) - 1)
    def _():
        o_ref[...] = (acc_ref[...] + b2_ref[...]).astype(o_ref.dtype)


# -----------------------------------------------------------------------------
# Wrapper helpers
# -----------------------------------------------------------------------------
def _vmem_budget_bytes():
    """Per-core VMEM capacity minus headroom (v5e/v6e: 128 MiB, v7x: 64 MiB)."""
    cap = 64 << 20  # conservative fallback (v7x)
    try:
        info = pltpu.get_tpu_info()
        c = getattr(info, "vmem_capacity_bytes", None)
        if c:
            cap = int(c)
    except Exception:
        pass
    return max(cap - (8 << 20), 16 << 20)


def _tile_vmem_bytes(tm, tp, Hp, in_bytes, out_bytes, use_scratch):
    # Double-buffered input/output tiles (+ optional f32 accumulator scratch).
    # (1, n) bias blocks still occupy a full 8-sublane VMEM tile.
    b = 2 * (tm * Hp * in_bytes        # x tile
             + Hp * tp * in_bytes      # W1 slab
             + tp * Hp * in_bytes      # W2 slab
             + 8 * tp * 4              # b1 slab
             + 8 * Hp * 4              # b2
             + tm * Hp * out_bytes)    # output tile
    if use_scratch:
        b += tm * Hp * 4
    return b


def prepare_ffn_params(w1, b1, w2, b2, *, compute_dtype=jnp.bfloat16):
    """Pad + cast the parameters once (hoisted out of the per-call path).

    w1: [hidden, posff], w2: [posff, hidden] (transposed vs. torch nn.Linear).
    Zero padding is mathematically inert: padded posff columns give
    relu(0 + 0) = 0 against zero W2 rows; padded hidden columns are sliced off.
    """
    hidden, posff = w1.shape
    Hp = _round_up(hidden, 128)
    Pp = _round_up(posff, 256)   # 256-aligned for 2x256x256 MXUs (v6e/v7x)
    w1_p = jnp.pad(w1, ((0, Hp - hidden), (0, Pp - posff))).astype(compute_dtype)
    w2_p = jnp.pad(w2, ((0, Pp - posff), (0, Hp - hidden))).astype(compute_dtype)
    b1_p = jnp.pad(b1, (0, Pp - posff)).astype(jnp.float32).reshape(1, Pp)
    b2_p = jnp.pad(b2, (0, Hp - hidden)).astype(jnp.float32).reshape(1, Hp)
    return dict(w1=w1_p, b1=b1_p, w2=w2_p, b2=b2_p,
                hidden=hidden, posff=posff, Hp=Hp, Pp=Pp,
                compute_dtype=compute_dtype)


def positionwise_feedforward_prepared(x, params, *, tm=512, tp=512):
    """x: [batch, seq, hidden]; params from prepare_ffn_params."""
    batch, seq, hidden = x.shape
    assert hidden == params["hidden"], "hidden dim mismatch vs. prepared params"
    posff = params["posff"]
    Hp, Pp = params["Hp"], params["Pp"]
    compute_dtype = params["compute_dtype"]
    out_dtype = x.dtype
    M = batch * seq

    in_b = jnp.dtype(compute_dtype).itemsize
    out_b = jnp.dtype(out_dtype).itemsize
    use_scratch = jnp.dtype(out_dtype) != jnp.dtype(jnp.float32)

    # --- row tiling: multiple of 16 (bf16 sublane packing); keep >= 2 row
    #     tiles when M allows so megacore can shard the parallel i-axis.
    tm = max(16, (tm // 16) * 16)
    Mp0 = _round_up(M, 16)
    tm_eff = min(tm, Mp0)
    if Mp0 >= 32 and tm_eff >= Mp0:
        tm_eff = _round_up(-(-Mp0 // 2), 16)

    # --- posff tiling: multiple of 256 that divides Pp (Pp is 256-aligned).
    tp = max(256, (tp // 256) * 256)
    tp_eff = min(tp, Pp)
    while Pp % tp_eff != 0:
        tp_eff -= 256

    # --- shrink tiles (tp first, then tm) until the working set fits VMEM.
    budget = _vmem_budget_bytes()

    def _fits(tm_, tp_):
        est_ = _tile_vmem_bytes(tm_, tp_, Hp, in_b, out_b, use_scratch)
        return est_ * 1.2 + (2 << 20) <= budget

    while not _fits(tm_eff, tp_eff) and tp_eff > 256:
        nxt = tp_eff - 256
        while Pp % nxt != 0:
            nxt -= 256
        tp_eff = nxt
    while not _fits(tm_eff, tp_eff) and tm_eff > 64:
        tm_eff = max(64, tm_eff - 64)

    Mp = _round_up(Mp0, tm_eff)

    # --- activation: pad only when needed.
    x2d = x.reshape(M, hidden)
    if (Mp != M) or (Hp != hidden):
        x2d = jnp.pad(x2d, ((0, Mp - M), (0, Hp - hidden)))
    x2d = x2d.astype(compute_dtype)

    n_i = Mp // tm_eff
    n_k = Pp // tp_eff
    grid = (n_i, n_k)

    est = _tile_vmem_bytes(tm_eff, tp_eff, Hp, in_b, out_b, use_scratch)
    vmem_limit = int(min(budget, max(est * 1.3 + (4 << 20), 16 << 20)))

    cost = pl.CostEstimate(
        flops=int(4 * M * hidden * posff),
        transcendentals=0,
        bytes_accessed=int(Mp * Hp * (in_b + out_b)            # x in, out
                           + n_i * 2 * Hp * Pp * in_b          # W1+W2 per row tile
                           + (Pp + Hp) * 4),                   # biases
    )

    kernel = _ffn_kernel_scratch if use_scratch else _ffn_kernel_f32out
    scratch_shapes = ([pltpu.VMEM((tm_eff, Hp), jnp.float32)]
                      if use_scratch else [])

    out2d = pl.pallas_call(
        kernel,
        out_shape=jax.ShapeDtypeStruct((Mp, Hp), out_dtype),
        grid_spec=pltpu.PrefetchScalarGridSpec(
            num_scalar_prefetch=0,
            grid=grid,
            in_specs=[
                pl.BlockSpec((tm_eff, Hp), lambda i, k: (i, 0)),   # x tile
                pl.BlockSpec((Hp, tp_eff), lambda i, k: (0, k)),   # W1 slab
                pl.BlockSpec((1, tp_eff), lambda i, k: (0, k)),    # b1 slab
                pl.BlockSpec((tp_eff, Hp), lambda i, k: (k, 0)),   # W2 slab
                pl.BlockSpec((1, Hp), lambda i, k: (0, 0)),        # b2
            ],
            out_specs=pl.BlockSpec((tm_eff, Hp), lambda i, k: (i, 0)),
            scratch_shapes=scratch_shapes,
        ),
        compiler_params=pltpu.CompilerParams(
            dimension_semantics=("parallel", "arbitrary"),
            vmem_limit_bytes=vmem_limit,
        ),
        cost_estimate=cost,
    )(x2d, params["w1"], params["b1"], params["w2"], params["b2"])

    if (Mp != M) or (Hp != hidden):
        out2d = out2d[:M, :hidden]
    return out2d.reshape(batch, seq, hidden)


def positionwise_feedforward(x, w1, b1, w2, b2, *, tm=512, tp=512,
                             compute_dtype=jnp.bfloat16):
    """Convenience one-shot path (pads/casts params per call)."""
    params = prepare_ffn_params(w1, b1, w2, b2, compute_dtype=compute_dtype)
    return positionwise_feedforward_prepared(x, params, tm=tm, tp=tp)


if __name__ == "__main__":
    # Small deterministic problem: batch=2, seq=8, hidden=32, posff=64.
    batch, seq, hidden, posff = 2, 8, 32, 64
    key = jax.random.PRNGKey(0)
    kx, kw1, kb1, kw2, kb2 = jax.random.split(key, 5)

    x = jax.random.normal(kx, (batch, seq, hidden), dtype=jnp.float32)

    # Deterministic parameter init (uniform, roughly nn.Linear's default
    # scale), stored transposed relative to PyTorch: W1 [hidden, posff],
    # W2 [posff, hidden].
    lim1 = 1.0 / (hidden ** 0.5)
    lim2 = 1.0 / (posff ** 0.5)
    w1 = jax.random.uniform(kw1, (hidden, posff), jnp.float32, -lim1, lim1)
    b1 = jax.random.uniform(kb1, (posff,), jnp.float32, -lim1, lim1)
    w2 = jax.random.uniform(kw2, (posff, hidden), jnp.float32, -lim2, lim2)
    b2 = jax.random.uniform(kb2, (hidden,), jnp.float32, -lim2, lim2)

    # Prepared-params path (weights padded/cast once, reused across calls).
    params = prepare_ffn_params(w1, b1, w2, b2)
    out = positionwise_feedforward_prepared(x, params)
    out = jax.block_until_ready(out)

    # Convenience path should agree exactly with the prepared path.
    out2 = jax.block_until_ready(positionwise_feedforward(x, w1, b1, w2, b2))

    # Pure-JAX f32 reference (kernel matmuls run in bf16 -> loose tolerance).
    ref = jnp.maximum(x @ w1 + b1, 0.0) @ w2 + b2
    assert out.shape == (batch, seq, hidden)
    assert jnp.allclose(out, ref, atol=3e-2, rtol=3e-2), "mismatch vs reference"
    assert jnp.allclose(out, out2), "prepared vs convenience path mismatch"

    print("KERNEL_OK")
</pallas_src>

<mosaic_0001>
module attributes {stable_mosaic.version = 11 : i64} {
  func.func @_ffn_kernel_f32out(%arg0: i32, %arg1: i32, %arg2: memref<16x128xbf16, #tpu.memory_space<vmem>>, %arg3: memref<128x256xbf16, #tpu.memory_space<vmem>>, %arg4: memref<1x256xf32, #tpu.memory_space<vmem>>, %arg5: memref<256x128xbf16, #tpu.memory_space<vmem>>, %arg6: memref<1x128xf32, #tpu.memory_space<vmem>>, %arg7: memref<16x128xf32, #tpu.memory_space<vmem>>) attributes {dimension_semantics = [#tpu.dimension_semantics<parallel>, #tpu.dimension_semantics<arbitrary>], iteration_bounds = array<i64: 1, 1>, scalar_prefetch = 0 : i64, scratch_operands = 0 : i64, tpu.core_type = #tpu.core_type<tc>, window_params = [{transform_indices = @transform_0, window_bounds = array<i64: 16, 128>}, {transform_indices = @transform_1, window_bounds = array<i64: 128, 256>}, {transform_indices = @transform_2, window_bounds = array<i64: 1, 256>}, {transform_indices = @transform_3, window_bounds = array<i64: 256, 128>}, {pipeline_mode = #tpu.pipeline_mode<synchronous>, transform_indices = @transform_4, window_bounds = array<i64: 1, 128>}, {transform_indices = @transform_5, window_bounds = array<i64: 16, 128>}]} {
    %c0 = arith.constant 0 : index
    %c0_0 = arith.constant 0 : index
    %0 = vector.load %arg2[%c0, %c0_0] : memref<16x128xbf16, #tpu.memory_space<vmem>>, vector<16x128xbf16>
    %c0_1 = arith.constant 0 : index
    %c0_2 = arith.constant 0 : index
    %1 = vector.load %arg3[%c0_1, %c0_2] : memref<128x256xbf16, #tpu.memory_space<vmem>>, vector<128x256xbf16>
    %cst = arith.constant dense<0.000000e+00> : vector<16x256xf32>
    %2 = tpu.matmul %0, %1, %cst {dimension_numbers = #tpu.dot_dimension_numbers<[1], [0], [0], [1], [0, 0, 1, 1], [], []>} : vector<16x128xbf16>, vector<128x256xbf16>, vector<16x256xf32> -> vector<16x256xf32>
    %c0_3 = arith.constant 0 : index
    %c0_4 = arith.constant 0 : index
    %3 = vector.load %arg4[%c0_3, %c0_4] : memref<1x256xf32, #tpu.memory_space<vmem>>, vector<1x256xf32>
    %4 = vector.broadcast %3 : vector<1x256xf32> to vector<16x256xf32>
    %5 = arith.addf %2, %4 : vector<16x256xf32>
    %cst_5 = arith.constant 0.000000e+00 : f32
    %6 = vector.broadcast %cst_5 : f32 to vector<16x256xf32>
    %7 = arith.maximumf %5, %6 : vector<16x256xf32>
    %8 = arith.truncf %7 : vector<16x256xf32> to vector<16x256xbf16>
    %c0_6 = arith.constant 0 : index
    %c0_7 = arith.constant 0 : index
    %9 = vector.load %arg5[%c0_6, %c0_7] : memref<256x128xbf16, #tpu.memory_space<vmem>>, vector<256x128xbf16>
    %cst_8 = arith.constant dense<0.000000e+00> : vector<16x128xf32>
    %10 = tpu.matmul %8, %9, %cst_8 {dimension_numbers = #tpu.dot_dimension_numbers<[1], [0], [0], [1], [0, 0, 1, 1], [], []>} : vector<16x256xbf16>, vector<256x128xbf16>, vector<16x128xf32> -> vector<16x128xf32>
    %c0_i32 = arith.constant 0 : i32
    %11 = arith.cmpi eq, %arg1, %c0_i32 : i32
    %12 = arith.extui %11 : i1 to i32
    %c0_i32_9 = arith.constant 0 : i32
    %13 = arith.cmpi ne, %12, %c0_i32_9 : i32
    scf.if %13 {
      %c0_14 = arith.constant 0 : index
      %c0_15 = arith.constant 0 : index
      %20 = vector.load %arg7[%c0_14, %c0_15] : memref<16x128xf32, #tpu.memory_space<vmem>>, vector<16x128xf32>
      tpu.vector_store %arg7[%c0_14, %c0_15], %10 {strides = array<i32>} : memref<16x128xf32, #tpu.memory_space<vmem>>, vector<16x128xf32>,
    } else {
    }
    %c0_i32_10 = arith.constant 0 : i32
    %14 = arith.cmpi sgt, %arg1, %c0_i32_10 : i32
    %15 = arith.extui %14 : i1 to i32
    %c0_i32_11 = arith.constant 0 : i32
    %16 = arith.cmpi ne, %15, %c0_i32_11 : i32
    scf.if %16 {
      %c0_14 = arith.constant 0 : index
      %c0_15 = arith.constant 0 : index
      %20 = vector.load %arg7[%c0_14, %c0_15] : memref<16x128xf32, #tpu.memory_space<vmem>>, vector<16x128xf32>
      %21 = arith.addf %20, %10 : vector<16x128xf32>
      %c0_16 = arith.constant 0 : index
      %c0_17 = arith.constant 0 : index
      %22 = vector.load %arg7[%c0_16, %c0_17] : memref<16x128xf32, #tpu.memory_space<vmem>>, vector<16x128xf32>
      tpu.vector_store %arg7[%c0_16, %c0_17], %21 {strides = array<i32>} : memref<16x128xf32, #tpu.memory_space<vmem>>, vector<16x128xf32>,
    } else {
    }
    %c0_i32_12 = arith.constant 0 : i32
    %17 = arith.cmpi eq, %arg1, %c0_i32_12 : i32
    %18 = arith.extui %17 : i1 to i32
    %c0_i32_13 = arith.constant 0 : i32
    %19 = arith.cmpi ne, %18, %c0_i32_13 : i32
    scf.if %19 {
      %c0_14 = arith.constant 0 : index
      %c0_15 = arith.constant 0 : index
      %20 = vector.load %arg7[%c0_14, %c0_15] : memref<16x128xf32, #tpu.memory_space<vmem>>, vector<16x128xf32>
      %c0_16 = arith.constant 0 : index
      %c0_17 = arith.constant 0 : index
      %21 = vector.load %arg6[%c0_16, %c0_17] : memref<1x128xf32, #tpu.memory_space<vmem>>, vector<1x128xf32>
      %22 = vector.broadcast %21 : vector<1x128xf32> to vector<16x128xf32>
      %23 = arith.addf %20, %22 : vector<16x128xf32>
      %c0_18 = arith.constant 0 : index
      %c0_19 = arith.constant 0 : index
      %24 = vector.load %arg7[%c0_18, %c0_19] : memref<16x128xf32, #tpu.memory_space<vmem>>, vector<16x128xf32>
      tpu.vector_store %arg7[%c0_18, %c0_19], %23 {strides = array<i32>} : memref<16x128xf32, #tpu.memory_space<vmem>>, vector<16x128xf32>,
    } else {
    }
    return
  }
  func.func @transform_0(%arg0: i32, %arg1: i32) -> (i32, i32) {
    %c0_i32 = arith.constant 0 : i32
    %c0_i32_0 = arith.constant 0 : i32
    return %arg0, %c0_i32 : i32, i32
  }
  func.func @transform_1(%arg0: i32, %arg1: i32) -> (i32, i32) {
    %c0_i32 = arith.constant 0 : i32
    %c0_i32_0 = arith.constant 0 : i32
    return %c0_i32, %arg1 : i32, i32
  }
  func.func @transform_2(%arg0: i32, %arg1: i32) -> (i32, i32) {
    %c0_i32 = arith.constant 0 : i32
    %c0_i32_0 = arith.constant 0 : i32
    return %c0_i32, %arg1 : i32, i32
  }
  func.func @transform_3(%arg0: i32, %arg1: i32) -> (i32, i32) {
    %c0_i32 = arith.constant 0 : i32
    %c0_i32_0 = arith.constant 0 : i32
    return %arg1, %c0_i32 : i32, i32
  }
  func.func @transform_4(%arg0: i32, %arg1: i32) -> (i32, i32) {
    %c0_i32 = arith.constant 0 : i32
    %c0_i32_0 = arith.constant 0 : i32
    %c0_i32_1 = arith.constant 0 : i32
    return %c0_i32, %c0_i32_0 : i32, i32
  }
  func.func @transform_5(%arg0: i32, %arg1: i32) -> (i32, i32) {
    %c0_i32 = arith.constant 0 : i32
    %c0_i32_0 = arith.constant 0 : i32
    return %arg0, %c0_i32 : i32, i32
  }
}

</mosaic_0001>

<bundles_post_ra>
// kernel: tpu_custom_call.1
= control target key start
LH: loop header
LB: loop body
LE: loop exit
PB: predicated region body
PF: predicated region fallthrough
CT: control target
= control target key end

     0   :  { %10 = vsyncpa [#allocation3], 0  ;;  %s798_s0 = inlined_call_operand.hbm [shape: bf16[16,128], index: 0, kind: input, shape index: {}]   ;;  %s799_s1 = inlined_call_operand.hbm [shape: bf16[128,256], index: 1, kind: input, shape index: {}]   ;;  %s800_s2 = inlined_call_operand.hbm [shape: f32[1,256], index: 2, kind: input, shape index: {}]   ;;  %s801_s3 = inlined_call_operand.hbm [shape: bf16[256,128], index: 3, kind: input, shape index: {}]   ;;  %s802_s4 = inlined_call_operand.vmem [shape: f32[1,128], index: 4, kind: input, shape index: {}]   ;;  %s803_s5 = inlined_call_operand.hbm [shape: f32[16,128], index: 5, kind: output, shape index: {}]  }
   0x1   :  { %11 = vsyncpa [#allocation6], 0 }
   0x2   :  { %12 = vsyncpa [#allocation9], 0  ;;  %s31_s20 = sshll.u32 %s799_s1, 4  ;;  %s32_s20 = int_to_ptr.hbm [resolvable:$true] %s31_s20 }
   0x3   :  { %13 = vsyncpa [#allocation4], 0  ;;  %s735_s21 = smov [#allocation5]   ;;  %s18_s25 = sshll.u32 %s798_s0, 4  ;;  %s19_s25 = int_to_ptr.hbm [resolvable:$true] %s18_s25 }
   0x4   :  { %s33_s22 = sshll.u32 %s735_s21, 4  ;;  %s736_s26 = smov 128   ;;  %s34_s22 = int_to_ptr.vmem [resolvable:$true] %s33_s22 }
   0x5   :  { %s737_s27 = smov 8   ;;  %s738_s28 = smov [#allocation2]  }
   0x6   :  { %39 = dma.hbm_to_vmem [thread:$0]  %s32_s20, 2048, %s34_s22, [#allocation6], %s736_s26, %s736_s26, %s737_s27  }
   0x7   :  { %s20_s29 = sshll.u32 %s738_s28, 4  ;;  %s739_s1 = smov 64   ;;  %s21_s29 = int_to_ptr.vmem [resolvable:$true] %s20_s29 }
   0x8   :  { %s740_s30 = smov 4   ;;  %s45_s8 = sshll.u32 %s800_s2, 4  ;;  %s46_s8 = int_to_ptr.hbm [resolvable:$true] %s45_s8 }
   0x9   :  { %26 = dma.hbm_to_vmem [thread:$0]  %s19_s25, 128, %s21_s29, [#allocation3], %s739_s1, %s739_s1, %s740_s30  }
   0xa   :  { %s741_s9 = smov [#allocation7]   ;;  %s55_s12 = sshll.u32 %s801_s3, 4  ;;  %s56_s12 = int_to_ptr.hbm [resolvable:$true] %s55_s12 }
   0xb   :  { %s47_s0 = sshll.u32 %s741_s9, 4  ;;  %s742_s13 = smov [#allocation8]   ;;  %s48_s0 = int_to_ptr.vmem [resolvable:$true] %s47_s0 }
   0xc   :  { %50 = dma.hbm_to_vmem [thread:$0]  %s46_s8, 32, %s48_s0, [#allocation6]  }
   0xd   :  { %s57_s14 = sshll.u32 %s742_s13, 4  ;;  %s58_s14 = int_to_ptr.vmem [resolvable:$true] %s57_s14 }
   0xe   :  { %63 = dma.hbm_to_vmem [thread:$0]  %s56_s12, 2048, %s58_s14, [#allocation9], %s739_s1, %s739_s1, %s740_s30  }
   0xf   :  { %727 = dma.done.wait [#allocation3], 128  }
  0x10   :  { %728 = vsyncadd [#allocation3], 4294967168 }
  0x11   :  { %729 = dma.done.wait [#allocation6], 2080  }
  0x12   :  { %730 = vsyncadd [#allocation6], 4294965216 }
  0x13   :  { %731 = dma.done.wait [#allocation9], 2048  }
  0x14   :  { %732 = vsyncadd [#allocation9], 4294965248  ;;  %v494_v0 = vld [vmem:[#allocation5 + $0x70] sm:$0xf]  ;;  %v580_v1 = vld [vmem:[#allocation5 + $0x74] sm:$0xf0] }
  0x15   :  { %v579_v2 = vld [vmem:[#allocation5 + $0x74] sm:$0xf]  ;;  %v495_v3 = vor.u32 %v580_v1, %v494_v0  ;;  %v496_v4 = vld [vmem:[#allocation5 + $0x78] sm:$0xf0]  ;;  %v486_v5 = vld [vmem:[#allocation5 + $0x60] sm:$0xf] }
  0x16   :  { %v578_v6 = vld [vmem:[#allocation5 + $0x64] sm:$0xf0]  ;;  %v499_v7 = vor.u32 %v579_v2, %v496_v4  ;;  %v577_v8 = vld [vmem:[#allocation5 + $0x64] sm:$0xf]  ;;  %v488_v9 = vld [vmem:[#allocation5 + $0x68] sm:$0xf0] }
  0x17   :  { %192 = vmatpush.bf16.msra.mxu0 %v495_v3  ;;  %v487_v10 = vor.u32 %v578_v6, %v486_v5  ;;  %v491_v11 = vor.u32 %v577_v8, %v488_v9  ;;  %v478_v12 = vld [vmem:[#allocation5 + $0x50] sm:$0xf]  ;;  %v576_v13 = vld [vmem:[#allocation5 + $0x54] sm:$0xf0]  ;;  %v575_v14 = vld [vmem:[#allocation5 + $0x54] sm:$0xf] }
  0x18   :  { %206 = vmatpush.bf16.msra.mxu1 %v499_v7  ;;  %v480_v15 = vld [vmem:[#allocation5 + $0x58] sm:$0xf0]  ;;  %v479_v16 = vor.u32 %v576_v13, %v478_v12  ;;  %v470_v18 = vld [vmem:[#allocation5 + $0x40] sm:$0xf]  ;;  %v574_v19 = vld [vmem:[#allocation5 + $0x44] sm:$0xf0] }
  0x19   :  { %v483_v17 = vor.u32 %v575_v14, %v480_v15  ;;  %v573_v20 = vld [vmem:[#allocation5 + $0x44] sm:$0xf]  ;;  %v472_v21 = vld [vmem:[#allocation5 + $0x48] sm:$0xf0]  ;;  %v471_v22 = vor.u32 %v574_v19, %v470_v18  ;;  %v588_v23 = vld [vmem:[#allocation8 + $0x38] sm:$0xff]  ;;  %s743_s15 = smov [#allocation10]  }
  0x1a   :  { %v596_v24 = vld [vmem:[#allocation8 + $0x78] sm:$0xff]  ;;  %v475_v25 = vor.u32 %v573_v20, %v472_v21  ;;  %v462_v26 = vld [vmem:[#allocation5 + $0x30] sm:$0xf]  ;;  %v571_v28 = vld [vmem:[#allocation5 + $0x34] sm:$0xf]  ;;  %354 = vmatpush.bf16.msra.mxu2 %v588_v23  ;;  %s415_s16 = sshll.u32 %s743_s15, 4  ;;  %s416_s16 = int_to_ptr.vmem [resolvable:$true] %s415_s16 }
  0x1b   :  { %193 = vmatpush.bf16.msra.mxu0 %v487_v10  ;;  %v572_v27 = vld [vmem:[#allocation5 + $0x34] sm:$0xf0]  ;;  %v464_v29 = vld [vmem:[#allocation5 + $0x38] sm:$0xf0]  ;;  %368 = vmatpush.bf16.msra.mxu3 %v596_v24  ;;  %v454_v34 = vld [vmem:[#allocation5 + $0x20] sm:$0xf] }
  0x1c   :  { %207 = vmatpush.bf16.msra.mxu1 %v491_v11  ;;  %v587_v30 = vld [vmem:[#allocation8 + $0x30] sm:$0xff]  ;;  %v463_v32 = vor.u32 %v572_v27, %v462_v26  ;;  %v467_v33 = vor.u32 %v571_v28, %v464_v29  ;;  %v570_v35 = vld [vmem:[#allocation5 + $0x24] sm:$0xf0]  ;;  %v569_v36 = vld [vmem:[#allocation5 + $0x24] sm:$0xf]  ;;  %s417_s19 = sshll.u32 %s803_s5, 4  ;;  %s418_s19 = int_to_ptr.hbm [resolvable:$true] %s417_s19 }
  0x1d   :  { %v595_v31 = vld [vmem:[#allocation8 + $0x70] sm:$0xff]  ;;  %v456_v37 = vld [vmem:[#allocation5 + $0x28] sm:$0xf0]  ;;  %v455_v40 = vor.u32 %v570_v35, %v454_v34  ;;  %v448_v45 = vld [vmem:[#allocation5 + $0x18] sm:$0xf0] }
  0x1e   :  { %355 = vmatpush.bf16.msra.mxu2 %v587_v30  ;;  %v586_v38 = vld [vmem:[#allocation8 + $0x28] sm:$0xff]  ;;  %v459_v41 = vor.u32 %v569_v36, %v456_v37  ;;  %v568_v43 = vld [vmem:[#allocation5 + $0x14] sm:$0xf0]  ;;  %v567_v44 = vld [vmem:[#allocation5 + $0x14] sm:$0xf] }
  0x1f   :  { %194 = vmatpush.bf16.msra.mxu0 %v479_v16  ;;  %369 = vmatpush.bf16.msra.mxu3 %v595_v31  ;;  %v594_v39 = vld [vmem:[#allocation8 + $0x68] sm:$0xff]  ;;  %v585_v46 = vld [vmem:[#allocation8 + $0x20] sm:$0xff]  ;;  %v451_v49 = vor.u32 %v567_v44, %v448_v45  ;;  %v564_v56 = vld [vmem:[#allocation2] sm:$0xff] }
  0x20   :  { %208 = vmatpush.bf16.msra.mxu1 %v483_v17  ;;  %v446_v42 = vld [vmem:[#allocation5 + $0x10] sm:$0xf]  ;;  %v593_v47 = vld [vmem:[#allocation8 + $0x60] sm:$0xff]  ;;  %v440_v53 = vld [vmem:[#allocation5 + $0x8] sm:$0xf0] }
  0x21   :  { %v447_v48 = vor.u32 %v568_v43, %v446_v42  ;;  %v438_v50 = vld [vmem:[#allocation5] sm:$0xf]  ;;  %v566_v51 = vld [vmem:[#allocation5 + $0x4] sm:$0xf0]  ;;  %v565_v52 = vld [vmem:[#allocation5 + $0x4] sm:$0xf] }
  0x22   :  { %356 = vmatpush.bf16.msra.mxu2 %v586_v38  ;;  %v439_v54 = vor.u32 %v566_v51, %v438_v50  ;;  %v443_v55 = vor.u32 %v565_v52, %v440_v53  ;;  %v584_v57 = vld [vmem:[#allocation8 + $0x18] sm:$0xff]  ;;  %v583_v59 = vld [vmem:[#allocation8 + $0x10] sm:$0xff]  ;;  %v582_v61 = vld [vmem:[#allocation8 + $0x8] sm:$0xff] }
  0x23   :  { %195 = vmatpush.bf16.msra.mxu0 %v471_v22  ;;  %370 = vmatpush.bf16.msra.mxu3 %v594_v39  ;;  %v592_v58 = vld [vmem:[#allocation8 + $0x58] sm:$0xff]  ;;  %v591_v60 = vld [vmem:[#allocation8 + $0x50] sm:$0xff]  ;;  %v590_v62 = vld [vmem:[#allocation8 + $0x48] sm:$0xff] }
  0x24   :  { %209 = vmatpush.bf16.msra.mxu1 %v475_v25  ;;  %v581_v63 = vld [vmem:[#allocation8] sm:$0xff]  ;;  %v100_v1 = vld [vmem:[#allocation7] sm:$0x3]  ;;  %v606_v19 = vld [vmem:[%s802_s4] ss:$0 sm:$0xff] }
  0x25   :  { %v589_v0 = vld [vmem:[#allocation8 + $0x40] sm:$0xff]  ;;  %v102_v4 = vperm.slane %v100_v1, 0  ;;  %v103_v5 = vperm.slane %v100_v1, 1 }
  0x26   :  { %357 = vmatpush.bf16.msra.mxu2 %v585_v46 }
  0x27   :  { %196 = vmatpush.bf16.msra.mxu0 %v463_v32  ;;  %371 = vmatpush.bf16.msra.mxu3 %v593_v47 }
  0x28   :  { %210 = vmatpush.bf16.msra.mxu1 %v467_v33 }
  0x2a   :  { %358 = vmatpush.bf16.msra.mxu2 %v584_v57 }
  0x2b   :  { %197 = vmatpush.bf16.msra.mxu0 %v455_v40  ;;  %372 = vmatpush.bf16.msra.mxu3 %v592_v58 }
  0x2c   :  { %211 = vmatpush.bf16.msra.mxu1 %v459_v41 }
  0x2e   :  { %359 = vmatpush.bf16.msra.mxu2 %v583_v59 }
  0x2f   :  { %198 = vmatpush.bf16.msra.mxu0 %v447_v48  ;;  %373 = vmatpush.bf16.msra.mxu3 %v591_v60 }
  0x30   :  { %212 = vmatpush.bf16.msra.mxu1 %v451_v49 }
  0x32   :  { %360 = vmatpush.bf16.msra.mxu2 %v582_v61 }
  0x33   :  { %199 = vmatpush.bf16.msra.mxu0 %v439_v54  ;;  %374 = vmatpush.bf16.msra.mxu3 %v590_v62 }
  0x34   :  { %213 = vmatpush.bf16.msra.mxu1 %v443_v55 }
  0x36   :  { %200 = vmatmul.bf16.vlgmr.msra.gmra.mxu0 %v564_v56  ;;  %361 = vmatpush.bf16.msra.mxu2 %v581_v63 }
  0x37   :  { %214 = vmatmul.bf16.vlgmr.msra.gmra.mxu1 %v564_v56  ;;  %375 = vmatpush.bf16.msra.mxu3 %v589_v0 }
  0xb3   :  { %v201_v2 = vpop.f32.mrf.mxu0 }
  0xb4   :  { %v215_v3 = vpop.f32.mrf.mxu1  ;;  %v202_v6 = vadd.f32 %v201_v2, %v102_v4 }
  0xb5   :  { %v216_v7 = vadd.f32 %v215_v3, %v103_v5 }
  0xb6   :  { %v220_v12 = vmax.f32 %v202_v6, 0.0 }
  0xb7   :  { %v221_v14 = vmax.f32 %v216_v7, 0.0 }
  0xbb   :  { %v203_v8 = vpop.f32.mrf.mxu0 }
  0xbc   :  { %v204_v9 = vadd.f32 %v203_v8, %v102_v4  ;;  %v217_v10 = vpop.f32.mrf.mxu1 }
  0xbd   :  { %v218_v11 = vadd.f32 %v217_v10, %v103_v5 }
  0xbe   :  { %v222_v13 = vmax.f32 %v204_v9, 0.0 }
  0xbf   :  { %v223_v15 = vmax.f32 %v218_v11, 0.0 }
  0xc0   :  { %v224_v16 = vpack.c.bf16 %v222_v13, %v220_v12 }
  0xc1   :  { %v225_v17 = vpack.c.bf16 %v223_v15, %v221_v14 }
  0xc2   :  { %362 = vmatmul.bf16.vlgmr.msra.gmra.mxu2 %v224_v16 }
  0xc3   :  { %376 = vmatmul.bf16.vlgmr.msra.gmra.mxu3 %v225_v17 }
 0x145   :  { %v363_v18 = vpop.f32.mrf.mxu2 }
 0x146   :  { %v377_v20 = vpop.f32.mrf.mxu3 }
 0x147   :  { %v378_v21 = vadd.f32 %v377_v20, %v363_v18 }
 0x149   :  { %v407_v22 = vadd.f32 %v606_v19, %v378_v21 }
 0x14b   :  { %409 = vst [vmem:[#allocation10] sm:$0xff] %v407_v22 }
 0x14d   :  { %v365_v23 = vpop.f32.mrf.mxu2 }
 0x14e   :  { %v379_v24 = vpop.f32.mrf.mxu3 }
 0x14f   :  { %v380_v25 = vadd.f32 %v379_v24, %v365_v23 }
 0x151   :  { %v408_v26 = vadd.f32 %v606_v19, %v380_v25 }
 0x153   :  { %410 = vst [vmem:[#allocation10 + $0x8] sm:$0xff] %v408_v26 }
 0x154   :  { %423 = dma.vmem_to_hbm [thread:$0]  %s416_s16, 256, %s418_s19, [#allocation4], %s736_s26, %s736_s26, %s737_s27  }
 0x155   :  { %733 = dma.done.wait [#allocation4], 256  }
 0x156   :  { %734 = vsyncadd [#allocation4], 4294967040 }
 0x157   :  { %428 = vsyncpa [#allocation3], 1 }
 0x158   :  { %429 = vsyncpa [#allocation6], 1 }
 0x159   :  { %430 = vsyncpa [#allocation9], 1 }
 0x15a   :  { %431 = vsyncpa [#allocation4], 1 }

</bundles_post_ra>
